<compile_context>
chip_gen: v7x
topology: tpu7x:2x2x1
jax: 0.10.0
libtpu: 0.0.40
codegen_flags: <defaults>
</compile_context>

<pallas_src>
import jax
import jax.numpy as jnp
from jax.experimental import pallas as pl
from jax.experimental.pallas import tpu as pltpu

_EPS = 1e-5                      # nn.BatchNorm3d default eps
_VMEM_BUDGET = 6 * 1024 * 1024   # double-buffered per-call block budget (bytes)


# ----------------------------------------------------------------------------
# Lane-tiled (channel-major) pallas_call helpers
# ----------------------------------------------------------------------------
def _pick_lane_tile(s, rows, budget=_VMEM_BUDGET):
    """Lane-tile TS (multiple of 128, or full extent) so that the f32,
    double-buffered blocks of all streamed operands fit `budget` bytes."""
    ts = budget // (2 * 4 * max(rows, 1))
    ts = max(128, ts // 128 * 128)
    if ts >= s:
        return s, 1                       # single full-extent block
    return ts, pl.cdiv(s, ts)


def _channel_major_pass(kernel, streamed, consts, out_channels, *,
                        semantics="parallel", out_dtype=jnp.float32):
    """Run `kernel` over channel-major (B, C_i, S) arrays tiled along S (lanes).

    streamed : list of (B, C_i, S) arrays  -> BlockSpec (1, C_i, TS)
    consts   : small 2-D parameter arrays  -> single full-extent blocks
    output   : (B, out_channels, S), streamed the same lane-dense way.
    """
    b, _, s = streamed[0].shape
    rows = sum(a.shape[1] for a in streamed) + out_channels
    ts, n_s = _pick_lane_tile(s, rows)

    in_specs = [pl.BlockSpec((1, a.shape[1], ts), lambda i, j: (i, 0, j))
                for a in streamed]
    in_specs += [pl.BlockSpec(a.shape, lambda i, j, nd=a.ndim: (0,) * nd)
                 for a in consts]

    return pl.pallas_call(
        kernel,
        grid=(b, n_s),
        in_specs=in_specs,
        out_specs=pl.BlockSpec((1, out_channels, ts), lambda i, j: (i, 0, j)),
        out_shape=jax.ShapeDtypeStruct((b, out_channels, s), out_dtype),
        compiler_params=pltpu.CompilerParams(
            dimension_semantics=(semantics, semantics)),
    )(*streamed, *consts)


# ----------------------------------------------------------------------------
# Pallas kernels (all operands channel-major: channels on sublanes, S on lanes)
# ----------------------------------------------------------------------------
def _phi_kernel(g_ref, w_ref, b_ref, o_ref):
    # packed 1x1x1 phi conv (+bias) for BOTH attention branches
    o_ref[0] = (jnp.dot(w_ref[...], g_ref[0],
                        preferred_element_type=jnp.float32) + b_ref[...])


def _attention_kernel(xp_ref, phi_ref, tw_ref, pw_ref, pb_ref, att_ref):
    # fused theta(patch matmul) -> +phi_up -> relu -> psi -> sigmoid,
    # both attention branches at once (inter channels stacked on sublanes).
    theta = jnp.dot(tw_ref[...], xp_ref[0], preferred_element_type=jnp.float32)
    f = jnp.maximum(theta + phi_ref[0], 0.0)
    s = jnp.dot(pw_ref[...], f, preferred_element_type=jnp.float32) + pb_ref[...]
    att_ref[0] = jax.nn.sigmoid(s)


def _finalize_kernel(x_ref, att_ref, w_ref, b_ref, o_ref):
    # fused epilogue: out = relu(Wf @ [att1*x ; att2*x] + bf)
    # (gate convs, both gate BNs, combine conv and combine BN folded into Wf/bf)
    x = x_ref[0]
    att = att_ref[0]
    y = jnp.concatenate([att[0:1, :] * x, att[1:2, :] * x], axis=0)
    u = jnp.dot(w_ref[...], y, preferred_element_type=jnp.float32) + b_ref[...]
    o_ref[0] = jnp.maximum(u, 0.0)


def _moments_pass(x_flat, att_flat):
    """Global first/second moments of Y = [att1*x ; att2*x]  (single pass)."""
    b, cin, s = x_flat.shape
    ts, n_s = _pick_lane_tile(s, cin + 2)

    def kernel(x_ref, att_ref, s1_ref, gram_ref):
        @pl.when(jnp.logical_and(pl.program_id(0) == 0, pl.program_id(1) == 0))
        def _():
            s1_ref[...] = jnp.zeros_like(s1_ref)
            gram_ref[...] = jnp.zeros_like(gram_ref)

        lane = jax.lax.broadcasted_iota(jnp.int32, (1, ts), 1)
        valid = (pl.program_id(1) * ts + lane) < s        # ragged-tail mask
        x = x_ref[0]
        att = att_ref[0]
        y = jnp.concatenate([jnp.where(valid, att[0:1, :] * x, 0.0),
                             jnp.where(valid, att[1:2, :] * x, 0.0)], axis=0)
        s1_ref[...] += jnp.sum(y, axis=1, keepdims=True)
        # one (2Cin, 2Cin) Gram matrix, contraction on the minor (lane) axis
        gram_ref[...] += jax.lax.dot_general(
            y, y, (((1,), (1,)), ((), ())), preferred_element_type=jnp.float32)

    return pl.pallas_call(
        kernel,
        grid=(b, n_s),
        in_specs=[pl.BlockSpec((1, cin, ts), lambda i, j: (i, 0, j)),
                  pl.BlockSpec((1, 2, ts), lambda i, j: (i, 0, j))],
        out_specs=(pl.BlockSpec((2 * cin, 1), lambda i, j: (0, 0)),
                   pl.BlockSpec((2 * cin, 2 * cin), lambda i, j: (0, 0))),
        out_shape=(jax.ShapeDtypeStruct((2 * cin, 1), jnp.float32),
                   jax.ShapeDtypeStruct((2 * cin, 2 * cin), jnp.float32)),
        compiler_params=pltpu.CompilerParams(
            dimension_semantics=("arbitrary", "arbitrary")),
    )(x_flat, att_flat)


# ----------------------------------------------------------------------------
# Trilinear resize (F.upsample / F.interpolate, align_corners=False), NCDHW.
# TODO(synk): interpolation gathers stay in plain JAX (not a Pallas hot path).
# ----------------------------------------------------------------------------
def _linear_resize_axis(x, axis, out_size):
    in_size = x.shape[axis]
    if in_size == out_size:
        return x
    scale = in_size / out_size
    j = jnp.arange(out_size, dtype=jnp.float32)
    src = jnp.maximum((j + 0.5) * scale - 0.5, 0.0)
    lo = jnp.minimum(jnp.floor(src).astype(jnp.int32), in_size - 1)
    hi = jnp.minimum(lo + 1, in_size - 1)
    shape = [1] * x.ndim
    shape[axis] = out_size
    frac = (src - lo.astype(jnp.float32)).reshape(shape)
    return (jnp.take(x, lo, axis=axis) * (1.0 - frac)
            + jnp.take(x, hi, axis=axis) * frac)


def _trilinear_resize(x, out_spatial):
    # x: (B, C, D, H, W) channel-major
    for ax, s in zip((2, 3, 4), out_spatial):
        x = _linear_resize_axis(x, ax, s)
    return x


# ----------------------------------------------------------------------------
# MultiAttentionBlock forward (both GridAttentionBlock3D branches batched)
# ----------------------------------------------------------------------------
def multi_attention_block(x, g, p1, p2, pc, sub_sample_factor=(2, 2, 2)):
    """x: (B, Cin, T, H, W) NCDHW; g: (B, Cg, Tg, Hg, Wg).  Returns (out, att)."""
    B, Cin, T, H, W = x.shape
    Bg, Cg, Tg, Hg, Wg = g.shape
    st, sh, sw = sub_sample_factor
    Tc, Hc, Wc = (T - st) // st + 1, (H - sh) // sh + 1, (W - sw) // sw + 1
    inter = p1["phi_w"].shape[0]
    K = Cin * st * sh * sw
    S, Sc, Sg = T * H * W, Tc * Hc * Wc, Tg * Hg * Wg

    # ---- pack both attention branches through shared kernels ----------------
    tw = jnp.concatenate([p1["theta_w"], p2["theta_w"]], axis=0)     # (2I, K)
    phw = jnp.concatenate([p1["phi_w"], p2["phi_w"]], axis=0)        # (2I, Cg)
    phb = jnp.concatenate([p1["phi_b"], p2["phi_b"]], axis=0)        # (2I, 1)
    psw = jnp.zeros((2, 2 * inter), jnp.float32)
    psw = psw.at[0, :inter].set(p1["psi_w"][0])
    psw = psw.at[1, inter:].set(p2["psi_w"][0])                      # (2, 2I)
    psb = jnp.concatenate([p1["psi_b"], p2["psi_b"]], axis=0)        # (2, 1)

    # ---- phi(g) on the gating grid, resized to theta's coarse grid ----------
    phi_g = _channel_major_pass(_phi_kernel, [g.reshape(Bg, Cg, Sg)],
                                [phw, phb], 2 * inter)
    phi_up = _trilinear_resize(phi_g.reshape(Bg, 2 * inter, Tg, Hg, Wg),
                               (Tc, Hc, Wc)).reshape(B, 2 * inter, Sc)

    # ---- theta patch matrix (channel-major, coarse spatial on lanes) --------
    # TODO(synk): this im2col transpose is the one remaining extra HBM pass
    # over x; fusing the patch gather into the attention kernel needs in-kernel
    # lane-strided relayouts (kernel=stride=(2,2,2)) that do not lower cleanly.
    # (Streaming xp as bf16 would halve its traffic if exactness is not needed.)
    xp = x[:, :, :Tc * st, :Hc * sh, :Wc * sw]
    xp = xp.reshape(B, Cin, Tc, st, Hc, sh, Wc, sw)
    xp = xp.transpose(0, 1, 3, 5, 7, 2, 4, 6).reshape(B, K, Sc)

    # ---- fused theta + phi + relu + psi + sigmoid at the coarse grid --------
    att_c = _channel_major_pass(_attention_kernel, [xp, phi_up],
                                [tw, psw, psb], 2)

    # ---- upsample both attention maps to the input grid (module output) -----
    # TODO(synk): folding this trilinear expansion into the two passes below
    # would save re-reading the full-resolution (B,2,S) attention map twice.
    att = _trilinear_resize(att_c.reshape(B, 2, Tc, Hc, Wc), (T, H, W))
    att_flat = att.reshape(B, 2, S)
    x_flat = x.reshape(B, Cin, S)

    # ---- pass 1: global moments of y_k = att_k * x ---------------------------
    s1, gram = _moments_pass(x_flat, att_flat)
    s1a, s1b = s1[:Cin], s1[Cin:]
    S11, S12, S22 = gram[:Cin, :Cin], gram[:Cin, Cin:], gram[Cin:, Cin:]

    # ---- fold gate Conv+BN (x2) and combine Conv+BN into Wf, bf --------------
    # TODO(synk): E[z^2]-E[z]^2 in f32 can lose precision at very large B*S;
    # switch to a centered/two-pass reduction if tolerances require it.
    Mtot = float(B * S)

    def _bn_fold(s1k, Skk, Wk, bk, gk, bek):
        t = Wk @ s1k                                         # (Cin,1)
        mean = (t + Mtot * bk) / Mtot
        sum_sq = jnp.diag(Wk @ Skk @ Wk.T)[:, None] + 2.0 * t * bk + Mtot * bk * bk
        var = jnp.maximum(sum_sq / Mtot - mean * mean, 0.0)
        alpha = gk * jax.lax.rsqrt(var + _EPS)
        kappa = bek - alpha * mean
        return alpha, kappa

    a1, k1 = _bn_fold(s1a, S11, p1["W_w"], p1["W_b"], p1["W_gamma"], p1["W_beta"])
    a2, k2 = _bn_fold(s1b, S22, p2["W_w"], p2["W_b"], p2["W_gamma"], p2["W_beta"])

    Wc1, Wc2 = pc["w"][:, :Cin], pc["w"][:, Cin:]
    A1 = (Wc1 * a1.T) @ p1["W_w"]                            # Wc1 diag(a1) W1
    A2 = (Wc2 * a2.T) @ p2["W_w"]
    c = (Wc1 @ (a1 * p1["W_b"] + k1) + Wc2 @ (a2 * p2["W_b"] + k2) + pc["b"])

    t_u = A1 @ s1a + A2 @ s1b
    quad = (A1 @ S11 @ A1.T + A1 @ S12 @ A2.T
            + A2 @ S12.T @ A1.T + A2 @ S22 @ A2.T)
    mean_u = (t_u + Mtot * c) / Mtot
    sum_u_sq = jnp.diag(quad)[:, None] + 2.0 * t_u * c + Mtot * c * c
    var_u = jnp.maximum(sum_u_sq / Mtot - mean_u * mean_u, 0.0)
    alpha_c = pc["gamma"] * jax.lax.rsqrt(var_u + _EPS)
    kappa_c = pc["beta"] - alpha_c * mean_u

    w_fold = jnp.concatenate([alpha_c * A1, alpha_c * A2], axis=1)   # (Cin, 2Cin)
    b_fold = alpha_c * c + kappa_c                                    # (Cin, 1)

    # ---- pass 2: fused gate + combine epilogue --------------------------------
    out = _channel_major_pass(_finalize_kernel, [x_flat, att_flat],
                              [w_fold, b_fold], Cin)
    return out.reshape(B, Cin, T, H, W), att


# ----------------------------------------------------------------------------
# Deterministic parameter construction (shapes follow the PyTorch __init__)
# ----------------------------------------------------------------------------
def _nrm(key, shape, scale=0.1):
    return scale * jax.random.normal(key, shape, jnp.float32)


def init_grid_attention_params(key, in_ch, gate_ch, inter_ch, k=(2, 2, 2)):
    ks = jax.random.split(key, 9)
    kt, kh, kw = k
    theta_w = _nrm(ks[0], (inter_ch, in_ch, kt, kh, kw))   # Conv3d(in, inter, k, stride=k, bias=False)
    phi_w = _nrm(ks[1], (inter_ch, gate_ch, 1, 1, 1))      # Conv3d(gate, inter, 1)
    phi_b = _nrm(ks[2], (inter_ch,))
    psi_w = _nrm(ks[3], (1, inter_ch, 1, 1, 1))            # Conv3d(inter, 1, 1)
    psi_b = _nrm(ks[4], (1,))
    W_w = _nrm(ks[5], (in_ch, in_ch, 1, 1, 1))             # Conv3d(in, in, 1)
    W_b = _nrm(ks[6], (in_ch,))
    W_gamma = 1.0 + _nrm(ks[7], (in_ch,))                  # BatchNorm3d(in)
    W_beta = _nrm(ks[8], (in_ch,))
    return {
        "theta_w": theta_w.reshape(inter_ch, in_ch * kt * kh * kw),  # (I, K)
        "phi_w": phi_w.reshape(inter_ch, gate_ch),                   # (I, Cg)
        "phi_b": phi_b.reshape(inter_ch, 1),
        "psi_w": psi_w.reshape(1, inter_ch),                         # (1, I)
        "psi_b": psi_b.reshape(1, 1),
        "W_w": W_w.reshape(in_ch, in_ch),                            # (Cin, Cin) [out, in]
        "W_b": W_b.reshape(in_ch, 1),
        "W_gamma": W_gamma.reshape(in_ch, 1),
        "W_beta": W_beta.reshape(in_ch, 1),
    }


def init_combine_params(key, in_ch):
    ks = jax.random.split(key, 4)
    w = _nrm(ks[0], (in_ch, 2 * in_ch, 1, 1, 1))           # Conv3d(2*in, in, 1)
    b = _nrm(ks[1], (in_ch,))
    gamma = 1.0 + _nrm(ks[2], (in_ch,))                    # BatchNorm3d(in)
    beta = _nrm(ks[3], (in_ch,))
    return {
        "w": w.reshape(in_ch, 2 * in_ch),                  # (Cin, 2Cin) [out, in]
        "b": b.reshape(in_ch, 1),
        "gamma": gamma.reshape(in_ch, 1),
        "beta": beta.reshape(in_ch, 1),
    }


# ----------------------------------------------------------------------------
if __name__ == "__main__":
    key = jax.random.PRNGKey(0)
    kx, kg, kp1, kp2, kpc = jax.random.split(key, 5)

    # in_size=8, gate_size=16, inter_size=8, sub_sample_factor=(2,2,2)
    B, Cin, Cg, Cint = 2, 8, 16, 8
    T, H, W = 8, 8, 8
    Tg, Hg, Wg = 4, 4, 4

    x = jax.random.normal(kx, (B, Cin, T, H, W), jnp.float32)   # PyTorch NCDHW
    g = jax.random.normal(kg, (B, Cg, Tg, Hg, Wg), jnp.float32)

    p1 = init_grid_attention_params(kp1, Cin, Cg, Cint)
    p2 = init_grid_attention_params(kp2, Cin, Cg, Cint)
    pc = init_combine_params(kpc, Cin)

    fwd = jax.jit(multi_attention_block)
    out, att = fwd(x, g, p1, p2, pc)
    jax.block_until_ready((out, att))

    assert out.shape == (B, Cin, T, H, W) and att.shape == (B, 2, T, H, W)
    assert bool(jnp.all(jnp.isfinite(out))) and bool(jnp.all(jnp.isfinite(att)))
    print("KERNEL_OK")
</pallas_src>

<mosaic_0001>
module attributes {stable_mosaic.version = 11 : i64} {
  func.func @_phi_kernel(%arg0: i32, %arg1: i32, %arg2: memref<1x16x64xf32, #tpu.memory_space<vmem>>, %arg3: memref<16x16xf32, #tpu.memory_space<vmem>>, %arg4: memref<16x1xf32, #tpu.memory_space<vmem>>, %arg5: memref<1x16x64xf32, #tpu.memory_space<vmem>>) attributes {dimension_semantics = [#tpu.dimension_semantics<parallel>, #tpu.dimension_semantics<parallel>], iteration_bounds = array<i64: 2, 1>, scalar_prefetch = 0 : i64, scratch_operands = 0 : i64, tpu.core_type = #tpu.core_type<tc>, window_params = [{transform_indices = @transform_0, window_bounds = array<i64: 1, 16, 64>}, {pipeline_mode = #tpu.pipeline_mode<synchronous>, transform_indices = @transform_1, window_bounds = array<i64: 16, 16>}, {pipeline_mode = #tpu.pipeline_mode<synchronous>, transform_indices = @transform_2, window_bounds = array<i64: 16, 1>}, {transform_indices = @transform_3, window_bounds = array<i64: 1, 16, 64>}]} {
    %c0 = arith.constant 0 : index
    %c0_0 = arith.constant 0 : index
    %0 = vector.load %arg3[%c0, %c0_0] : memref<16x16xf32, #tpu.memory_space<vmem>>, vector<16x16xf32>
    %c0_1 = arith.constant 0 : index
    %c0_2 = arith.constant 0 : index
    %c0_3 = arith.constant 0 : index
    %1 = vector.load %arg2[%c0_1, %c0_2, %c0_3] : memref<1x16x64xf32, #tpu.memory_space<vmem>>, vector<1x16x64xf32>
    %2 = vector.shape_cast %1 : vector<1x16x64xf32> to vector<16x64xf32>
    %cst = arith.constant dense<0.000000e+00> : vector<16x64xf32>
    %3 = tpu.matmul %0, %2, %cst {dimension_numbers = #tpu.dot_dimension_numbers<[1], [0], [0], [1], [0, 0, 1, 1], [], []>} : vector<16x16xf32>, vector<16x64xf32>, vector<16x64xf32> -> vector<16x64xf32>
    %c0_4 = arith.constant 0 : index
    %c0_5 = arith.constant 0 : index
    %4 = vector.load %arg4[%c0_4, %c0_5] : memref<16x1xf32, #tpu.memory_space<vmem>>, vector<16x1xf32>
    %5 = vector.broadcast %4 : vector<16x1xf32> to vector<16x64xf32>
    %6 = arith.addf %3, %5 : vector<16x64xf32>
    %c0_6 = arith.constant 0 : index
    %c0_7 = arith.constant 0 : index
    %c0_8 = arith.constant 0 : index
    %7 = vector.load %arg5[%c0_6, %c0_7, %c0_8] : memref<1x16x64xf32, #tpu.memory_space<vmem>>, vector<1x16x64xf32>
    %8 = vector.shape_cast %7 : vector<1x16x64xf32> to vector<16x64xf32>
    %9 = vector.shape_cast %6 : vector<16x64xf32> to vector<1x16x64xf32>
    tpu.vector_store %arg5[%c0_6, %c0_7, %c0_8], %9 {strides = array<i32>} : memref<1x16x64xf32, #tpu.memory_space<vmem>>, vector<1x16x64xf32>,
    return
  }
  func.func @transform_0(%arg0: i32, %arg1: i32) -> (i32, i32, i32) {
    %c0_i32 = arith.constant 0 : i32
    %c0_i32_0 = arith.constant 0 : i32
    return %arg0, %c0_i32, %arg1 : i32, i32, i32
  }
  func.func @transform_1(%arg0: i32, %arg1: i32) -> (i32, i32) {
    %c0_i32 = arith.constant 0 : i32
    %c0_i32_0 = arith.constant 0 : i32
    %c0_i32_1 = arith.constant 0 : i32
    return %c0_i32, %c0_i32_0 : i32, i32
  }
  func.func @transform_2(%arg0: i32, %arg1: i32) -> (i32, i32) {
    %c0_i32 = arith.constant 0 : i32
    %c0_i32_0 = arith.constant 0 : i32
    %c0_i32_1 = arith.constant 0 : i32
    return %c0_i32, %c0_i32_0 : i32, i32
  }
  func.func @transform_3(%arg0: i32, %arg1: i32) -> (i32, i32, i32) {
    %c0_i32 = arith.constant 0 : i32
    %c0_i32_0 = arith.constant 0 : i32
    return %arg0, %c0_i32, %arg1 : i32, i32, i32
  }
}

module attributes {stable_mosaic.version = 11 : i64} {
  func.func @_attention_kernel(%arg0: i32, %arg1: i32, %arg2: memref<1x64x64xf32, #tpu.memory_space<vmem>>, %arg3: memref<1x16x64xf32, #tpu.memory_space<vmem>>, %arg4: memref<16x64xf32, #tpu.memory_space<vmem>>, %arg5: memref<2x16xf32, #tpu.memory_space<vmem>>, %arg6: memref<2x1xf32, #tpu.memory_space<vmem>>, %arg7: memref<1x2x64xf32, #tpu.memory_space<vmem>>) attributes {dimension_semantics = [#tpu.dimension_semantics<parallel>, #tpu.dimension_semantics<parallel>], iteration_bounds = array<i64: 2, 1>, scalar_prefetch = 0 : i64, scratch_operands = 0 : i64, tpu.core_type = #tpu.core_type<tc>, window_params = [{transform_indices = @transform_0, window_bounds = array<i64: 1, 64, 64>}, {transform_indices = @transform_1, window_bounds = array<i64: 1, 16, 64>}, {pipeline_mode = #tpu.pipeline_mode<synchronous>, transform_indices = @transform_2, window_bounds = array<i64: 16, 64>}, {pipeline_mode = #tpu.pipeline_mode<synchronous>, transform_indices = @transform_3, window_bounds = array<i64: 2, 16>}, {pipeline_mode = #tpu.pipeline_mode<synchronous>, transform_indices = @transform_4, window_bounds = array<i64: 2, 1>}, {transform_indices = @transform_5, window_bounds = array<i64: 1, 2, 64>}]} {
    %c0 = arith.constant 0 : index
    %c0_0 = arith.constant 0 : index
    %0 = vector.load %arg4[%c0, %c0_0] : memref<16x64xf32, #tpu.memory_space<vmem>>, vector<16x64xf32>
    %c0_1 = arith.constant 0 : index
    %c0_2 = arith.constant 0 : index
    %c0_3 = arith.constant 0 : index
    %1 = vector.load %arg2[%c0_1, %c0_2, %c0_3] : memref<1x64x64xf32, #tpu.memory_space<vmem>>, vector<1x64x64xf32>
    %2 = vector.shape_cast %1 : vector<1x64x64xf32> to vector<64x64xf32>
    %cst = arith.constant dense<0.000000e+00> : vector<16x64xf32>
    %3 = tpu.matmul %0, %2, %cst {dimension_numbers = #tpu.dot_dimension_numbers<[1], [0], [0], [1], [0, 0, 1, 1], [], []>} : vector<16x64xf32>, vector<64x64xf32>, vector<16x64xf32> -> vector<16x64xf32>
    %c0_4 = arith.constant 0 : index
    %c0_5 = arith.constant 0 : index
    %c0_6 = arith.constant 0 : index
    %4 = vector.load %arg3[%c0_4, %c0_5, %c0_6] : memref<1x16x64xf32, #tpu.memory_space<vmem>>, vector<1x16x64xf32>
    %5 = vector.shape_cast %4 : vector<1x16x64xf32> to vector<16x64xf32>
    %6 = arith.addf %3, %5 : vector<16x64xf32>
    %cst_7 = arith.constant 0.000000e+00 : f32
    %7 = vector.broadcast %cst_7 : f32 to vector<16x64xf32>
    %8 = arith.maximumf %6, %7 : vector<16x64xf32>
    %c0_8 = arith.constant 0 : index
    %c0_9 = arith.constant 0 : index
    %9 = vector.load %arg5[%c0_8, %c0_9] : memref<2x16xf32, #tpu.memory_space<vmem>>, vector<2x16xf32>
    %cst_10 = arith.constant dense<0.000000e+00> : vector<2x64xf32>
    %10 = tpu.matmul %9, %8, %cst_10 {dimension_numbers = #tpu.dot_dimension_numbers<[1], [0], [0], [1], [0, 0, 1, 1], [], []>} : vector<2x16xf32>, vector<16x64xf32>, vector<2x64xf32> -> vector<2x64xf32>
    %c0_11 = arith.constant 0 : index
    %c0_12 = arith.constant 0 : index
    %11 = vector.load %arg6[%c0_11, %c0_12] : memref<2x1xf32, #tpu.memory_space<vmem>>, vector<2x1xf32>
    %12 = vector.broadcast %11 : vector<2x1xf32> to vector<2x64xf32>
    %13 = arith.addf %10, %12 : vector<2x64xf32>
    %14 = arith.negf %13 : vector<2x64xf32>
    %15 = math.exp %14 : vector<2x64xf32>
    %cst_13 = arith.constant 1.000000e+00 : f32
    %16 = vector.broadcast %cst_13 : f32 to vector<2x64xf32>
    %17 = arith.addf %16, %15 : vector<2x64xf32>
    %18 = arith.divf %16, %17 : vector<2x64xf32>
    %c0_14 = arith.constant 0 : index
    %c0_15 = arith.constant 0 : index
    %c0_16 = arith.constant 0 : index
    %19 = vector.load %arg7[%c0_14, %c0_15, %c0_16] : memref<1x2x64xf32, #tpu.memory_space<vmem>>, vector<1x2x64xf32>
    %20 = vector.shape_cast %19 : vector<1x2x64xf32> to vector<2x64xf32>
    %21 = vector.shape_cast %18 : vector<2x64xf32> to vector<1x2x64xf32>
    tpu.vector_store %arg7[%c0_14, %c0_15, %c0_16], %21 {strides = array<i32>} : memref<1x2x64xf32, #tpu.memory_space<vmem>>, vector<1x2x64xf32>,
    return
  }
  func.func @transform_0(%arg0: i32, %arg1: i32) -> (i32, i32, i32) {
    %c0_i32 = arith.constant 0 : i32
    %c0_i32_0 = arith.constant 0 : i32
    return %arg0, %c0_i32, %arg1 : i32, i32, i32
  }
  func.func @transform_1(%arg0: i32, %arg1: i32) -> (i32, i32, i32) {
    %c0_i32 = arith.constant 0 : i32
    %c0_i32_0 = arith.constant 0 : i32
    return %arg0, %c0_i32, %arg1 : i32, i32, i32
  }
  func.func @transform_2(%arg0: i32, %arg1: i32) -> (i32, i32) {
    %c0_i32 = arith.constant 0 : i32
    %c0_i32_0 = arith.constant 0 : i32
    %c0_i32_1 = arith.constant 0 : i32
    return %c0_i32, %c0_i32_0 : i32, i32
  }
  func.func @transform_3(%arg0: i32, %arg1: i32) -> (i32, i32) {
    %c0_i32 = arith.constant 0 : i32
    %c0_i32_0 = arith.constant 0 : i32
    %c0_i32_1 = arith.constant 0 : i32
    return %c0_i32, %c0_i32_0 : i32, i32
  }
  func.func @transform_4(%arg0: i32, %arg1: i32) -> (i32, i32) {
    %c0_i32 = arith.constant 0 : i32
    %c0_i32_0 = arith.constant 0 : i32
    %c0_i32_1 = arith.constant 0 : i32
    return %c0_i32, %c0_i32_0 : i32, i32
  }
  func.func @transform_5(%arg0: i32, %arg1: i32) -> (i32, i32, i32) {
    %c0_i32 = arith.constant 0 : i32
    %c0_i32_0 = arith.constant 0 : i32
    return %arg0, %c0_i32, %arg1 : i32, i32, i32
  }
}

module attributes {stable_mosaic.version = 11 : i64} {
  func.func @kernel(%arg0: i32, %arg1: i32, %arg2: memref<1x8x512xf32, #tpu.memory_space<vmem>>, %arg3: memref<1x2x512xf32, #tpu.memory_space<vmem>>, %arg4: memref<16x1xf32, #tpu.memory_space<vmem>>, %arg5: memref<16x16xf32, #tpu.memory_space<vmem>>) attributes {dimension_semantics = [#tpu.dimension_semantics<arbitrary>, #tpu.dimension_semantics<arbitrary>], iteration_bounds = array<i64: 2, 1>, scalar_prefetch = 0 : i64, scratch_operands = 0 : i64, tpu.core_type = #tpu.core_type<tc>, window_params = [{transform_indices = @transform_0, window_bounds = array<i64: 1, 8, 512>}, {transform_indices = @transform_1, window_bounds = array<i64: 1, 2, 512>}, {pipeline_mode = #tpu.pipeline_mode<synchronous>, transform_indices = @transform_2, window_bounds = array<i64: 16, 1>}, {pipeline_mode = #tpu.pipeline_mode<synchronous>, transform_indices = @transform_3, window_bounds = array<i64: 16, 16>}]} {
    %c0_i32 = arith.constant 0 : i32
    %0 = arith.cmpi eq, %arg0, %c0_i32 : i32
    %c0_i32_0 = arith.constant 0 : i32
    %1 = arith.cmpi eq, %arg1, %c0_i32_0 : i32
    %2 = arith.andi %0, %1 : i1
    %3 = arith.extui %2 : i1 to i32
    %c0_i32_1 = arith.constant 0 : i32
    %4 = arith.cmpi ne, %3, %c0_i32_1 : i32
    scf.if %4 {
      %cst_19 = arith.constant 0.000000e+00 : f32
      %39 = vector.broadcast %cst_19 : f32 to vector<16x1xf32>
      %c0_20 = arith.constant 0 : index
      %c0_21 = arith.constant 0 : index
      %40 = vector.load %arg4[%c0_20, %c0_21] : memref<16x1xf32, #tpu.memory_space<vmem>>, vector<16x1xf32>
      tpu.vector_store %arg4[%c0_20, %c0_21], %39 {strides = array<i32>} : memref<16x1xf32, #tpu.memory_space<vmem>>, vector<16x1xf32>,
      %cst_22 = arith.constant 0.000000e+00 : f32
      %41 = vector.broadcast %cst_22 : f32 to vector<16x16xf32>
      %c0_23 = arith.constant 0 : index
      %c0_24 = arith.constant 0 : index
      %42 = vector.load %arg5[%c0_23, %c0_24] : memref<16x16xf32, #tpu.memory_space<vmem>>, vector<16x16xf32>
      tpu.vector_store %arg5[%c0_23, %c0_24], %41 {strides = array<i32>} : memref<16x16xf32, #tpu.memory_space<vmem>>, vector<16x16xf32>,
    } else {
    }
    %5 = tpu.iota {dimensions = array<i32: 1>} : vector<1x512xi32>
    %c512_i32 = arith.constant 512 : i32
    %6 = arith.muli %arg1, %c512_i32 : i32
    %7 = vector.broadcast %6 : i32 to vector<1x512xi32>
    %8 = arith.addi %7, %5 : vector<1x512xi32>
    %c512_i32_2 = arith.constant 512 : i32
    %9 = vector.broadcast %c512_i32_2 : i32 to vector<1x512xi32>
    %10 = arith.cmpi slt, %8, %9 : vector<1x512xi32>
    %c0 = arith.constant 0 : index
    %c0_3 = arith.constant 0 : index
    %c0_4 = arith.constant 0 : index
    %11 = vector.load %arg2[%c0, %c0_3, %c0_4] : memref<1x8x512xf32, #tpu.memory_space<vmem>>, vector<1x8x512xf32>
    %12 = vector.shape_cast %11 : vector<1x8x512xf32> to vector<8x512xf32>
    %c0_5 = arith.constant 0 : index
    %c0_6 = arith.constant 0 : index
    %c0_7 = arith.constant 0 : index
    %13 = vector.load %arg3[%c0_5, %c0_6, %c0_7] : memref<1x2x512xf32, #tpu.memory_space<vmem>>, vector<1x2x512xf32>
    %14 = vector.shape_cast %13 : vector<1x2x512xf32> to vector<2x512xf32>
    %15 = vector.extract_strided_slice %14 {offsets = [0, 0], sizes = [1, 512], strides = [1, 1]} : vector<2x512xf32> to vector<1x512xf32>
    %16 = vector.broadcast %15 : vector<1x512xf32> to vector<8x512xf32>
    %17 = arith.mulf %16, %12 : vector<8x512xf32>
    %cst = arith.constant 0.000000e+00 : f32
    %18 = vector.shape_cast %10 : vector<1x512xi1> to vector<1x512xi1>
    %19 = vector.broadcast %18 : vector<1x512xi1> to vector<8x512xi1>
    %20 = vector.broadcast %cst : f32 to vector<8x512xf32>
    %21 = arith.select %19, %17, %20 : vector<8x512xi1>, vector<8x512xf32>
    %22 = vector.extract_strided_slice %14 {offsets = [1, 0], sizes = [1, 512], strides = [1, 1]} : vector<2x512xf32> to vector<1x512xf32>
    %23 = vector.broadcast %22 : vector<1x512xf32> to vector<8x512xf32>
    %24 = arith.mulf %23, %12 : vector<8x512xf32>
    %cst_8 = arith.constant 0.000000e+00 : f32
    %25 = vector.shape_cast %10 : vector<1x512xi1> to vector<1x512xi1>
    %26 = vector.broadcast %25 : vector<1x512xi1> to vector<8x512xi1>
    %27 = vector.broadcast %cst_8 : f32 to vector<8x512xf32>
    %28 = arith.select %26, %24, %27 : vector<8x512xi1>, vector<8x512xf32>
    %29 = tpu.concatenate %21, %28 in 0 : vector<8x512xf32>, vector<8x512xf32> -> vector<16x512xf32>
    %c0_9 = arith.constant 0 : index
    %c0_10 = arith.constant 0 : index
    %30 = vector.load %arg4[%c0_9, %c0_10] : memref<16x1xf32, #tpu.memory_space<vmem>>, vector<16x1xf32>
    %cst_11 = arith.constant dense<0.000000e+00> : vector<16xf32>
    %31 = vector.multi_reduction <add>, %29, %cst_11 [1] : vector<16x512xf32> to vector<16xf32>
    %32 = vector.shape_cast %31 : vector<16xf32> to vector<16x1xf32>
    %33 = arith.addf %30, %32 : vector<16x1xf32>
    %c0_12 = arith.constant 0 : index
    %c0_13 = arith.constant 0 : index
    %34 = vector.load %arg4[%c0_12, %c0_13] : memref<16x1xf32, #tpu.memory_space<vmem>>, vector<16x1xf32>
    tpu.vector_store %arg4[%c0_12, %c0_13], %33 {strides = array<i32>} : memref<16x1xf32, #tpu.memory_space<vmem>>, vector<16x1xf32>,
    %c0_14 = arith.constant 0 : index
    %c0_15 = arith.constant 0 : index
    %35 = vector.load %arg5[%c0_14, %c0_15] : memref<16x16xf32, #tpu.memory_space<vmem>>, vector<16x16xf32>
    %cst_16 = arith.constant dense<0.000000e+00> : vector<16x16xf32>
    %36 = tpu.matmul %29, %29, %cst_16 {dimension_numbers = #tpu.dot_dimension_numbers<[1], [1], [0], [0], [0, 0, 1, 0], [], []>} : vector<16x512xf32>, vector<16x512xf32>, vector<16x16xf32> -> vector<16x16xf32>
    %37 = arith.addf %35, %36 : vector<16x16xf32>
    %c0_17 = arith.constant 0 : index
    %c0_18 = arith.constant 0 : index
    %38 = vector.load %arg5[%c0_17, %c0_18] : memref<16x16xf32, #tpu.memory_space<vmem>>, vector<16x16xf32>
    tpu.vector_store %arg5[%c0_17, %c0_18], %37 {strides = array<i32>} : memref<16x16xf32, #tpu.memory_space<vmem>>, vector<16x16xf32>,
    return
  }
  func.func @transform_0(%arg0: i32, %arg1: i32) -> (i32, i32, i32) {
    %c0_i32 = arith.constant 0 : i32
    %c0_i32_0 = arith.constant 0 : i32
    return %arg0, %c0_i32, %arg1 : i32, i32, i32
  }
  func.func @transform_1(%arg0: i32, %arg1: i32) -> (i32, i32, i32) {
    %c0_i32 = arith.constant 0 : i32
    %c0_i32_0 = arith.constant 0 : i32
    return %arg0, %c0_i32, %arg1 : i32, i32, i32
  }
  func.func @transform_2(%arg0: i32, %arg1: i32) -> (i32, i32) {
    %c0_i32 = arith.constant 0 : i32
    %c0_i32_0 = arith.constant 0 : i32
    %c0_i32_1 = arith.constant 0 : i32
    return %c0_i32, %c0_i32_0 : i32, i32
  }
  func.func @transform_3(%arg0: i32, %arg1: i32) -> (i32, i32) {
    %c0_i32 = arith.constant 0 : i32
    %c0_i32_0 = arith.constant 0 : i32
    %c0_i32_1 = arith.constant 0 : i32
    return %c0_i32, %c0_i32_0 : i32, i32
  }
}

module attributes {stable_mosaic.version = 11 : i64} {
  func.func @_finalize_kernel(%arg0: i32, %arg1: i32, %arg2: memref<1x8x512xf32, #tpu.memory_space<vmem>>, %arg3: memref<1x2x512xf32, #tpu.memory_space<vmem>>, %arg4: memref<8x16xf32, #tpu.memory_space<vmem>>, %arg5: memref<8x1xf32, #tpu.memory_space<vmem>>, %arg6: memref<1x8x512xf32, #tpu.memory_space<vmem>>) attributes {dimension_semantics = [#tpu.dimension_semantics<parallel>, #tpu.dimension_semantics<parallel>], iteration_bounds = array<i64: 2, 1>, scalar_prefetch = 0 : i64, scratch_operands = 0 : i64, tpu.core_type = #tpu.core_type<tc>, window_params = [{transform_indices = @transform_0, window_bounds = array<i64: 1, 8, 512>}, {transform_indices = @transform_1, window_bounds = array<i64: 1, 2, 512>}, {pipeline_mode = #tpu.pipeline_mode<synchronous>, transform_indices = @transform_2, window_bounds = array<i64: 8, 16>}, {pipeline_mode = #tpu.pipeline_mode<synchronous>, transform_indices = @transform_3, window_bounds = array<i64: 8, 1>}, {transform_indices = @transform_4, window_bounds = array<i64: 1, 8, 512>}]} {
    %c0 = arith.constant 0 : index
    %c0_0 = arith.constant 0 : index
    %c0_1 = arith.constant 0 : index
    %0 = vector.load %arg2[%c0, %c0_0, %c0_1] : memref<1x8x512xf32, #tpu.memory_space<vmem>>, vector<1x8x512xf32>
    %1 = vector.shape_cast %0 : vector<1x8x512xf32> to vector<8x512xf32>
    %c0_2 = arith.constant 0 : index
    %c0_3 = arith.constant 0 : index
    %c0_4 = arith.constant 0 : index
    %2 = vector.load %arg3[%c0_2, %c0_3, %c0_4] : memref<1x2x512xf32, #tpu.memory_space<vmem>>, vector<1x2x512xf32>
    %3 = vector.shape_cast %2 : vector<1x2x512xf32> to vector<2x512xf32>
    %4 = vector.extract_strided_slice %3 {offsets = [0, 0], sizes = [1, 512], strides = [1, 1]} : vector<2x512xf32> to vector<1x512xf32>
    %5 = vector.broadcast %4 : vector<1x512xf32> to vector<8x512xf32>
    %6 = arith.mulf %5, %1 : vector<8x512xf32>
    %7 = vector.extract_strided_slice %3 {offsets = [1, 0], sizes = [1, 512], strides = [1, 1]} : vector<2x512xf32> to vector<1x512xf32>
    %8 = vector.broadcast %7 : vector<1x512xf32> to vector<8x512xf32>
    %9 = arith.mulf %8, %1 : vector<8x512xf32>
    %10 = tpu.concatenate %6, %9 in 0 : vector<8x512xf32>, vector<8x512xf32> -> vector<16x512xf32>
    %c0_5 = arith.constant 0 : index
    %c0_6 = arith.constant 0 : index
    %11 = vector.load %arg4[%c0_5, %c0_6] : memref<8x16xf32, #tpu.memory_space<vmem>>, vector<8x16xf32>
    %cst = arith.constant dense<0.000000e+00> : vector<8x512xf32>
    %12 = tpu.matmul %11, %10, %cst {dimension_numbers = #tpu.dot_dimension_numbers<[1], [0], [0], [1], [0, 0, 1, 1], [], []>} : vector<8x16xf32>, vector<16x512xf32>, vector<8x512xf32> -> vector<8x512xf32>
    %c0_7 = arith.constant 0 : index
    %c0_8 = arith.constant 0 : index
    %13 = vector.load %arg5[%c0_7, %c0_8] : memref<8x1xf32, #tpu.memory_space<vmem>>, vector<8x1xf32>
    %14 = vector.broadcast %13 : vector<8x1xf32> to vector<8x512xf32>
    %15 = arith.addf %12, %14 : vector<8x512xf32>
    %cst_9 = arith.constant 0.000000e+00 : f32
    %16 = vector.broadcast %cst_9 : f32 to vector<8x512xf32>
    %17 = arith.maximumf %15, %16 : vector<8x512xf32>
    %c0_10 = arith.constant 0 : index
    %c0_11 = arith.constant 0 : index
    %c0_12 = arith.constant 0 : index
    %18 = vector.load %arg6[%c0_10, %c0_11, %c0_12] : memref<1x8x512xf32, #tpu.memory_space<vmem>>, vector<1x8x512xf32>
    %19 = vector.shape_cast %18 : vector<1x8x512xf32> to vector<8x512xf32>
    %20 = vector.shape_cast %17 : vector<8x512xf32> to vector<1x8x512xf32>
    tpu.vector_store %arg6[%c0_10, %c0_11, %c0_12], %20 {strides = array<i32>} : memref<1x8x512xf32, #tpu.memory_space<vmem>>, vector<1x8x512xf32>,
    return
  }
  func.func @transform_0(%arg0: i32, %arg1: i32) -> (i32, i32, i32) {
    %c0_i32 = arith.constant 0 : i32
    %c0_i32_0 = arith.constant 0 : i32
    return %arg0, %c0_i32, %arg1 : i32, i32, i32
  }
  func.func @transform_1(%arg0: i32, %arg1: i32) -> (i32, i32, i32) {
    %c0_i32 = arith.constant 0 : i32
    %c0_i32_0 = arith.constant 0 : i32
    return %arg0, %c0_i32, %arg1 : i32, i32, i32
  }
  func.func @transform_2(%arg0: i32, %arg1: i32) -> (i32, i32) {
    %c0_i32 = arith.constant 0 : i32
    %c0_i32_0 = arith.constant 0 : i32
    %c0_i32_1 = arith.constant 0 : i32
    return %c0_i32, %c0_i32_0 : i32, i32
  }
  func.func @transform_3(%arg0: i32, %arg1: i32) -> (i32, i32) {
    %c0_i32 = arith.constant 0 : i32
    %c0_i32_0 = arith.constant 0 : i32
    %c0_i32_1 = arith.constant 0 : i32
    return %c0_i32, %c0_i32_0 : i32, i32
  }
  func.func @transform_4(%arg0: i32, %arg1: i32) -> (i32, i32, i32) {
    %c0_i32 = arith.constant 0 : i32
    %c0_i32_0 = arith.constant 0 : i32
    return %arg0, %c0_i32, %arg1 : i32, i32, i32
  }
}

</mosaic_0001>

<bundles_post_ra>
// kernel: multi_attention_block.4
= control target key start
LH: loop header
LB: loop body
LE: loop exit
PB: predicated region body
PF: predicated region fallthrough
CT: control target
= control target key end

     0   :  { %s487_s12 = smov 0   ;;  %s489_s13 = smov 0   ;;  %s534_s0 = inlined_call_operand.vmem [shape: f32[2,16,64], index: 0, kind: input, shape index: {}]   ;;  %s535_s1 = inlined_call_operand.vmem [shape: f32[16,16], index: 1, kind: input, shape index: {}]   ;;  %s536_s2 = inlined_call_operand.vmem [shape: f32[16,1], index: 2, kind: input, shape index: {}]   ;;  %s537_s3 = inlined_call_operand.vmem [shape: f32[2,16,64], index: 3, kind: output, shape index: {}]  }
   0x1   :  { %s491_s14 = smov 0  }
   0x2 LB: > { %s25_s15 = sadd.s32 1, %s460_s13  ;;  %p390_p0 = scmp.ge.s32.totalorder %s464_s14, 1  ;;  %s464_s14 = sphi %s491_s14, %s13_s14   ;;  %s460_s13 = sphi %s489_s13, %s539_s13   ;;  %s456_s12 = sphi %s487_s12, %s538_s12  }
   0x3   : > { %p27_p1 = scmp.ge.s32.totalorder %s25_s15, 2  ;;  %p156_p2 = scmp.lt.s32.totalorder %s464_s14, 3 }
   0x5   : > { %s541_s15 = smov (%p27_p1, %s25_s15), 0  ;;  %p157_p3 = pnand %p390_p0, %p156_p2 }
   0x6   : > { %p186_p4 = scmp.lt.s32.totalorder (!%p157_p3), %s456_s12, 1  ;;  %v202_v0 = vld [vmem:[%s535_s1] sm:$0xff] (!%p157_p3)  ;;  %vm218_vm0 = vcmask (!%p157_p3), 130048   ;;  %v466_v2 = vmov (!%p157_p3), 0   ;;  %v207_v3 = vld [vmem:[%s536_s2 + $0x8] sm:$0xff] (!%p157_p3)  ;;  %vm300_vm1 = vcmask (!%p157_p3), 523264  }
   0x7   : > { %160 = sbr.rel (%p157_p3) target bundleno = 240 (0xf0), region = 32  ;;  %v206_v1 = vld [vmem:[%s536_s2] sm:$0xff] (!%p157_p3)  ;;  %409 = vmatprep.mubr.msk.f32.mxu0 (!%p157_p3), %vm218_vm0, %v202_v0  ;;  %441 = vset.pattern.permute.xlu0 (!%p157_p3), %v466_v2  ;;  %v203_v7 = vld [vmem:[%s535_s1 + $0x8] sm:$0xff] (!%p157_p3) }
   0x8   : > { %210 = vperm.xlu0 (!%p157_p3), %441, %v206_v1  }
   0xc   : > { %215 = vperm.xlu0 (!%p157_p3), %441, %v207_v3  }
   0xe   : > { %s543_s12 = smov (!%p186_p4, %s456_s12), 1 }
   0xf   : > { %s399_s22 = sshll.u32 %s543_s12, 4 }
  0x10   : > { %s193_s25 = scalar_lea.vmem %s534_s0, %s399_s22  ;;  %s201_s30 = scalar_lea.vmem %s537_s3, %s399_s22 }
  0x11   : > { %v204_v4 = vld [vmem:[%s193_s25] sm:$0xff]  ;;  %v205_v5 = vld [vmem:[%s193_s25 + $0x8] sm:$0xff] }
  0x12   : > { %v412_v6 = vpack.c.bf16 %v205_v5, %v204_v4 }
  0x14   : > { %413 = vmatprep.subr.bf16.mxu0 %v412_v6 }
  0x15   : > { %415 = vmatpush3.bf16.msra.mxu0 %v412_v6 }
  0x18   : > { %410 = vmatmul.mubr.msk.f32.vlgmr.msra.gmra.mrb[0].mxu0 %vm218_vm0, %v203_v7 }
  0x87   : > { %v211_v8 = vpop.permute.xlu0 %210 }
  0x8b   : > { %v216_v9 = vpop.permute.xlu0 %215 }
  0xeb   : > { %v411_v10 = vpop.f32.mrb[0].mxu0 }
  0xec   : > { %v297_v11 = vadd.f32 %v411_v10, %v216_v9  ;;  %v291_v12 = vpop.f32.mrb[1].mxu0 }
  0xed   : > { %v292_v13 = vadd.f32 %v291_v12, %v211_v8 }
  0xee   : > { %302 = vst.msk [vmem:[%s201_s30 + $0x8] sm:$0xff] %vm300_vm1, %v297_v11 }
  0xef   : > { %301 = vst.msk [vmem:[%s201_s30] sm:$0xff] %vm300_vm1, %v292_v13 }
  0xf0 PF: > { %s13_s14 = sadd.s32 1, %s464_s14   ;;  %s538_s12 = smov %s460_s13 }
  0xf1   : > { %p10_p5 = scmp.ge.s32.totalorder %s13_s14, 4   ;;  %s539_s13 = smov %s541_s15 }
  0xf3   :  { %12 = sbr.rel (!%p10_p5) target bundleno = 2 (0x2), region = 62 }

// kernel: multi_attention_block.5
= control target key start
LH: loop header
LB: loop body
LE: loop exit
PB: predicated region body
PF: predicated region fallthrough
CT: control target
= control target key end

     0   :  { %s732_s18 = smov 0   ;;  %s734_s19 = smov 0   ;;  %s787_s0 = inlined_call_operand.vmem [shape: f32[2,64,64], index: 0, kind: input, shape index: {}]   ;;  %s788_s1 = inlined_call_operand.vmem [shape: f32[2,16,64], index: 1, kind: input, shape index: {}]   ;;  %s789_s2 = inlined_call_operand.vmem [shape: f32[16,64], index: 2, kind: input, shape index: {}]   ;;  %s790_s3 = inlined_call_operand.vmem [shape: f32[2,16], index: 3, kind: input, shape index: {}]   ;;  %s791_s4 = inlined_call_operand.vmem [shape: f32[2,1], index: 4, kind: input, shape index: {}]   ;;  %s792_s5 = inlined_call_operand.vmem [shape: f32[2,2,64], index: 5, kind: output, shape index: {}]  }
   0x1   :  { %s736_s20 = smov 0  }
   0x2 LB: > { %s27_s21 = sadd.s32 1, %s692_s19  ;;  %p569_p0 = scmp.ge.s32.totalorder %s696_s20, 1  ;;  %s696_s20 = sphi %s736_s20, %s15_s20   ;;  %s692_s19 = sphi %s734_s19, %s794_s19   ;;  %s688_s18 = sphi %s732_s18, %s793_s18  }
   0x3   : > { %p29_p1 = scmp.ge.s32.totalorder %s27_s21, 2  ;;  %p221_p2 = scmp.lt.s32.totalorder %s696_s20, 3 }
   0x5   : > { %s796_s21 = smov (%p29_p1, %s27_s21), 0  ;;  %p222_p3 = pnand %p569_p0, %p221_p2 }
   0x6   : > { %p262_p4 = scmp.lt.s32.totalorder (!%p222_p3), %s688_s18, 1  ;;  %v285_v0 = vld [vmem:[%s789_s2] sm:$0xff] (!%p222_p3)  ;;  %vm297_vm0 = vcmask (!%p222_p3), 523264   ;;  %v286_v13 = vld [vmem:[%s789_s2 + $0x8] sm:$0xff] (!%p222_p3)  ;;  %v698_v14 = vmov (!%p222_p3), 0.0|0.0   ;;  %vm699_vm1 = vmmov (!%p222_p3), 0  }
   0x7   : > { %225 = sbr.rel (%p222_p3) target bundleno = 499 (0x1f3), region = 40  ;;  %612 = vmatprep.mubr.msk.f32.mxu0 (!%p222_p3), %vm297_vm0, %v285_v0  ;;  %638 = vmatprep.subr.bf16.mxu1 (!%p222_p3), %v698_v14  ;;  %v700_v15 = vmov (!%p222_p3), 0.0   ;;  %v382_v16 = vld [vmem:[%s791_s4] sm:$0x3] (!%p222_p3)  ;;  %v701_v17 = vmov (!%p222_p3), 0   ;;  %vm388_vm2 = vcmask (!%p222_p3), 130048  }
   0x8   : > { %619 = vmatprep.mubr.msk.f32.mxu1 (!%p222_p3), %vm699_vm1, %v700_v15  ;;  %669 = vset.pattern.permute.xlu0 (!%p222_p3), %v701_v17  ;;  %v381_v27 = vld [vmem:[%s790_s3] sm:$0x3] (!%p222_p3)  ;;  %vm468_vm3 = vcmask (!%p222_p3), 517120  }
   0x9   : > { %385 = vperm.xlu0 (!%p222_p3), %669, %v382_v16  }
   0xe   : > { %s798_s18 = smov (!%p262_p4, %s688_s18), 1 }
   0xf   : > { %s581_s24 = sshll.u32 %s798_s18, 6  ;;  %s582_s7 = sshll.u32 %s798_s18, 4 }
  0x10   : > { %s269_s27 = scalar_lea.vmem %s787_s0, %s581_s24  ;;  %s277_s10 = scalar_lea.vmem %s788_s1, %s582_s7 }
  0x11   : > { %v287_v1 = vld [vmem:[%s269_s27] sm:$0xff]  ;;  %v288_v2 = vld [vmem:[%s269_s27 + $0x8] sm:$0xff]  ;;  %v289_v3 = vld [vmem:[%s269_s27 + $0x10] sm:$0xff]  ;;  %s574_s13 = sshll.u32 %s798_s18, 1 }
  0x12   : > { %v622_v4 = vpack.c.bf16 %v288_v2, %v287_v1  ;;  %v290_v5 = vld [vmem:[%s269_s27 + $0x18] sm:$0xff]  ;;  %v291_v7 = vld [vmem:[%s269_s27 + $0x20] sm:$0xff]  ;;  %v292_v8 = vld [vmem:[%s269_s27 + $0x28] sm:$0xff]  ;;  %s284_s16 = scalar_lea.vmem %s792_s5, %s574_s13 }
  0x13   : > { %v626_v6 = vpack.c.bf16 %v290_v5, %v289_v3  ;;  %v630_v9 = vpack.c.bf16 %v292_v8, %v291_v7  ;;  %v293_v10 = vld [vmem:[%s269_s27 + $0x30] sm:$0xff]  ;;  %v294_v11 = vld [vmem:[%s269_s27 + $0x38] sm:$0xff]  ;;  %v296_v18 = vld [vmem:[%s277_s10 + $0x8] sm:$0xff] }
  0x14   : > { %623 = vmatprep.subr.bf16.mxu0 %v622_v4  ;;  %v634_v12 = vpack.c.bf16 %v294_v11, %v293_v10  ;;  %v295_v19 = vld [vmem:[%s277_s10] sm:$0xff] }
  0x15   : > { %625 = vmatpush3.bf16.msra.mxu0 %v622_v4 }
  0x16   : > { %627 = vmatprep.subr.bf16.mxu0 %v626_v6 }
  0x19   : > { %629 = vmatpush3.bf16.msra.mxu0 %v626_v6 }
  0x1a   : > { %631 = vmatprep.subr.bf16.mxu0 %v630_v9 }
  0x1d   : > { %633 = vmatpush3.bf16.msra.mxu0 %v630_v9 }
  0x1e   : > { %635 = vmatprep.subr.bf16.mxu0 %v634_v12 }
  0x21   : > { %637 = vmatpush3.bf16.msra.mxu0 %v634_v12 }
  0x24   : > { %613 = vmatmul.mubr.msk.f32.vlgmr.msra.gmra.mrb[0].mxu0 %vm297_vm0, %v286_v13 }
  0x88   : > { %v386_v28 = vpop.permute.xlu0 %385 }
  0xf7   : > { %v614_v20 = vpop.f32.mrb[0].mxu0 }
  0xf8   : > { %v376_v21 = vadd.f32 %v614_v20, %v296_v18  ;;  %v370_v22 = vpop.f32.mrb[1].mxu0 }
  0xf9   : > { %v371_v23 = vadd.f32 %v370_v22, %v295_v19 }
  0xfa   : > { %v380_v24 = vmax.f32 %v376_v21, 0.0 }
  0xfb   : > { %v379_v25 = vmax.f32 %v371_v23, 0.0 }
  0xfd   : > { %v639_v26 = vpack.c.bf16 %v380_v24, %v379_v25 }
  0xff   : > { %640 = vmatpush3.bf16.msra.mxu1 %v639_v26 }
 0x102   : > { %620 = vmatmul.mubr.msk.f32.vlgmr.msra.gmra.mrb[0].mxu1 %vm388_vm2, %v381_v27 }
 0x1d5   : > { %v458_v29 = vpop.f32.mrb[0].mxu1 }
 0x1d6   : > { %v459_v30 = vadd.f32 %v458_v29, %v386_v28  ;;  %v621_v31 = vpop.f32.mrb[1].mxu1 }
 0x1d8   : > { %v578_v32 = vmul.f32 -1.442695, %v459_v30 }
 0x1da   : > { %670 = vpow2.f32 %v578_v32 }
 0x1e4   : > { %v671_v33 = vpop.eup %670 }
 0x1e5   : > { %v465_v34 = vadd.f32 1.0, %v671_v33 }
 0x1e7   : > { %672 = vrcp.f32 %v465_v34 }
 0x1f1   : > { %v673_v35 = vpop.eup %672 }
 0x1f2   : > { %469 = vst.msk [vmem:[%s284_s16] sm:$0x3] %vm468_vm3, %v673_v35 }
 0x1f3 PF: > { %s15_s20 = sadd.s32 1, %s696_s20   ;;  %s793_s18 = smov %s692_s19 }
 0x1f4   : > { %p12_p5 = scmp.ge.s32.totalorder %s15_s20, 4   ;;  %s794_s19 = smov %s796_s21 }
 0x1f6   :  { %14 = sbr.rel (!%p12_p5) target bundleno = 2 (0x2), region = 73 }

// kernel: multi_attention_block.6
= control target key start
LH: loop header
LB: loop body
LE: loop exit
PB: predicated region body
PF: predicated region fallthrough
CT: control target
= control target key end

     0   :  { %s679_s12 = smov 0   ;;  %s681_s13 = smov 0   ;;  %s754_s0 = inlined_call_operand.vmem [shape: f32[2,8,512], index: 0, kind: input, shape index: {}]   ;;  %s755_s1 = inlined_call_operand.vmem [shape: f32[2,2,512], index: 1, kind: input, shape index: {}]   ;;  %s756_s2 = inlined_call_operand.vmem [shape: f32[16,1], index: 2, kind: output, shape index: {0}]   ;;  %s757_s3 = inlined_call_operand.vmem [shape: f32[16,16], index: 3, kind: output, shape index: {1}]  }
   0x1   :  { %s683_s14 = smov 0  }
   0x2 LB: > { %s26_s15 = sadd.s32 1, %s652_s13  ;;  %p590_p0 = scmp.ge.s32.totalorder %s656_s14, 1  ;;  %s656_s14 = sphi %s683_s14, %s14_s14   ;;  %s652_s13 = sphi %s681_s13, %s759_s13   ;;  %s648_s12 = sphi %s679_s12, %s758_s12  }
   0x3   : > { %p28_p1 = scmp.ge.s32.totalorder %s26_s15, 2  ;;  %p166_p2 = scmp.lt.s32.totalorder %s656_s14, 3 }
   0x5   : > { %s761_s15 = smov (%p28_p1, %s26_s15), 0  ;;  %p167_p3 = pnand %p590_p0, %p166_p2 }
   0x6   : > { %p199_p4 = scmp.lt.s32.totalorder (!%p167_p3), %s648_s12, 1  ;;  %p218_p5 = scmp.eq.s32.totalorder (!%p167_p3), %s648_s12, 0 }
   0x7   : > { %170 = sbr.rel (%p167_p3) target bundleno = 265 (0x109), region = 28 }
   0xe   : > { %s763_s12 = smov (!%p199_p4, %s648_s12), 1  ;;  %223 = sbr.rel (!%p218_p5) target bundleno = 21 (0x15), region = 32 }
   0xf   : > { %s598_s16 = sshll.u32 %s763_s12, 5  ;;  %s599_s17 = sshll.u32 %s763_s12, 3  ;;  %vm224_vm0 = vcmask (%p218_p5), 7168   ;;  %vm227_vm1 = vcmask (%p218_p5), 130048   ;;  %v658_v0 = vmov (%p218_p5), 0.0  }
  0x10   : > { %s700_s20 = scalar_lea.vmem %s754_s0, %s598_s16  ;;  %s216_s23 = scalar_lea.vmem %s755_s1, %s599_s17  ;;  %225 = vst.msk [vmem:[%s756_s2] sm:$0xff] (%p218_p5), %vm224_vm0, %v658_v0  ;;  %226 = vst.msk [vmem:[%s756_s2 + $0x8] sm:$0xff] (%p218_p5), %vm224_vm0, %v658_v0 }
  0x11   : > { %228 = vst.msk [vmem:[%s757_s3] sm:$0xff] (%p218_p5), %vm227_vm1, %v658_v0  ;;  %229 = vst.msk [vmem:[%s757_s3 + $0x8] sm:$0xff] (%p218_p5), %vm227_vm1, %v658_v0 }
  0x15 PF: > { %v251_v1 = vlaneseq  ;;  %v249_v3 = vld [vmem:[%s216_s23] sm:$0xff]  ;;  %v246_v16 = vld [vmem:[%s700_s20 + $0x8] sm:$0xff]  ;;  %v248_v24 = vld [vmem:[%s700_s20 + $0x18] sm:$0xff]  ;;  %vm361_vm2 = vcmask 7168   ;;  %vm518_vm3 = vcmask 130048  }
  0x16   : > { %v245_v19 = vld [vmem:[%s700_s20] sm:$0xff]  ;;  %v247_v27 = vld [vmem:[%s700_s20 + $0x10] sm:$0xff] }
  0x17   : > { %v252_v2 = vshrl.u32 %v251_v1, 7  ;;  %v347_v50 = vld [vmem:[%s756_s2] sm:$0xff]  ;;  %v348_v53 = vld [vmem:[%s756_s2 + $0x8] sm:$0xff] }
  0x18   : > { %v364_v57 = vld [vmem:[%s757_s3] sm:$0xff]  ;;  %v365_v0 = vld [vmem:[%s757_s3 + $0x8] sm:$0xff] }
  0x19   : > { %v253_v4 = vsub.s32 0, %v252_v2  ;;  %v257_v5 = vsub.s32 2, %v252_v2  ;;  %v305_v6 = vsub.s32 1, %v252_v2  ;;  %v309_v7 = vsub.s32 3, %v252_v2 }
  0x1a   : > { %v265_v8 = vsub.s32 6, %v252_v2  ;;  %v317_v9 = vsub.s32 7, %v252_v2  ;;  %v261_v10 = vsub.s32 4, %v252_v2  ;;  %v313_v11 = vsub.s32 5, %v252_v2 }
  0x1b   : > { %v258_v12 = vrot.slane %v249_v3, %v257_v5  ;;  %v310_v13 = vrot.slane %v249_v3, %v309_v7  ;;  %v254_v14 = vrot.slane %v249_v3, %v253_v4  ;;  %v306_v15 = vrot.slane %v249_v3, %v305_v6 }
  0x1c   : > { %v266_v17 = vrot.slane %v249_v3, %v265_v8  ;;  %v318_v18 = vrot.slane %v249_v3, %v317_v9  ;;  %v262_v20 = vrot.slane %v249_v3, %v261_v10  ;;  %v314_v21 = vrot.slane %v249_v3, %v313_v11 }
  0x1d   : > { %v278_v22 = vrot.slane %v258_v12, %v253_v4  ;;  %v330_v23 = vrot.slane %v310_v13, %v305_v6  ;;  %v274_v25 = vrot.slane %v254_v14, %v253_v4  ;;  %v326_v26 = vrot.slane %v306_v15, %v305_v6 }
  0x1e   : > { %v286_v28 = vrot.slane %v266_v17, %v253_v4  ;;  %v338_v29 = vrot.slane %v318_v18, %v305_v6  ;;  %v282_v30 = vrot.slane %v262_v20, %v253_v4  ;;  %v334_v31 = vrot.slane %v314_v21, %v305_v6 }
  0x1f   : > { %v288_v32 = vmul.f32 %v278_v22, %v246_v16  ;;  %v340_v33 = vmul.f32 %v330_v23, %v246_v16  ;;  %v287_v34 = vmul.f32 %v274_v25, %v245_v19  ;;  %v339_v35 = vmul.f32 %v326_v26, %v245_v19 }
  0x20   : > { %v290_v36 = vmul.f32 %v286_v28, %v248_v24  ;;  %v342_v37 = vmul.f32 %v338_v29, %v248_v24  ;;  %v289_v38 = vmul.f32 %v282_v30, %v247_v27  ;;  %v341_v39 = vmul.f32 %v334_v31, %v247_v27 }
  0x21   : > { %v601_v40 = vpack.c.bf16 %v340_v33, %v288_v32  ;;  %v603_v41 = vpack.c.bf16 %v339_v35, %v287_v34  ;;  %430 = vmatprep.mubr.f32.mxu0 %v288_v32  ;;  %v349_v42 = vadd.f32 %v288_v32, %v287_v34  ;;  %v354_v43 = vadd.f32 %v340_v33, %v339_v35 }
  0x22   : > { %v605_v44 = vpack.c.bf16 %v342_v37, %v290_v36  ;;  %v607_v45 = vpack.c.bf16 %v341_v39, %v289_v38  ;;  %505 = vmatprep.mubr.f32.mxu1 %v290_v36 }
  0x23   : > { %602 = vmatprep.subr.bf16.mxu0 %v601_v40  ;;  %v350_v46 = vadd.f32 %v349_v42, %v289_v38  ;;  %v355_v47 = vadd.f32 %v354_v43, %v341_v39 }
  0x24   : > { %606 = vmatprep.subr.bf16.mxu1 %v605_v44  ;;  %604 = vmatpush1.bf16.xpose.msra.mxu0 %v603_v41 }
  0x25   : > { %608 = vmatpush1.bf16.xpose.msra.mxu1 %v607_v45  ;;  %v351_v48 = vadd.f32 %v350_v46, %v290_v36  ;;  %v356_v49 = vadd.f32 %v355_v47, %v342_v37 }
  0x27   : > { %352 = vadd.xlane.f32.xlu0 %v351_v48 }
  0x2b   : > { %431 = vmatmul.mubr.f32.vlgmr.msra.gmra.mrb[0].mxu0 %v287_v34  ;;  %357 = vadd.xlane.f32.xlu0 %v356_v49 }
  0x2c   : > { %506 = vmatmul.mubr.f32.vlgmr.msra.gmra.mrb[0].mxu1 %v289_v38  ;;  %435 = vmatprep.mubr.f32.mxu0 %v340_v33 }
  0x2d   : > { %510 = vmatprep.mubr.f32.mxu1 %v342_v37 }
  0x2f   : > { %436 = vmatmul.mubr.f32.gmra.mrb[2].mxu0 %v339_v35 }
  0x30   : > { %511 = vmatmul.mubr.f32.gmra.mrb[2].mxu1 %v341_v39 }
  0xb4   : > { %v353_v51 = vpop.xlane.xlu0 %352 }
  0xb5   : > { %v359_v52 = vadd.f32 %v353_v51, %v347_v50 }
  0xb7   : > { %362 = vst.msk [vmem:[%s756_s2] sm:$0xff] %vm361_vm2, %v359_v52 }
  0xb8   : > { %v358_v54 = vpop.xlane.xlu0 %357 }
  0xb9   : > { %v360_v55 = vadd.f32 %v358_v54, %v348_v53 }
  0xbb   : > { %363 = vst.msk [vmem:[%s756_s2 + $0x8] sm:$0xff] %vm361_vm2, %v360_v55 }
  0xfe   : > { %v432_v56 = vpop.f32.mrb[0].mxu0 }
  0xff   : > { %v507_v58 = vpop.f32.mrb[0].mxu1  ;;  %v434_v59 = vpop.f32.mrb[1].mxu0 }
 0x100   : > { %v508_v60 = vadd.f32 %v507_v58, %v432_v56  ;;  %v509_v61 = vpop.f32.mrb[1].mxu1 }
 0x102   : > { %v516_v62 = vadd.f32 %v508_v60, %v364_v57  ;;  %v437_v63 = vpop.f32.mrb[2].mxu0 }
 0x103   : > { %v512_v1 = vpop.f32.mrb[2].mxu1  ;;  %v439_v2 = vpop.f32.mrb[3].mxu0 }
 0x104   : > { %519 = vst.msk [vmem:[%s757_s3] sm:$0xff] %vm518_vm3, %v516_v62  ;;  %v513_v3 = vadd.f32 %v512_v1, %v437_v63  ;;  %v514_v4 = vpop.f32.mrb[3].mxu1 }
 0x106   : > { %v517_v5 = vadd.f32 %v513_v3, %v365_v0 }
 0x108   : > { %520 = vst.msk [vmem:[%s757_s3 + $0x8] sm:$0xff] %vm518_vm3, %v517_v5 }
 0x109 PF: > { %s14_s14 = sadd.s32 1, %s656_s14   ;;  %s758_s12 = smov %s652_s13 }
 0x10a   : > { %p11_p6 = scmp.ge.s32.totalorder %s14_s14, 4   ;;  %s759_s13 = smov %s761_s15 }
 0x10c   :  { %13 = sbr.rel (!%p11_p6) target bundleno = 2 (0x2), region = 69 }

// kernel: multi_attention_block.7
= control target key start
LH: loop header
LB: loop body
LE: loop exit
PB: predicated region body
PF: predicated region fallthrough
CT: control target
= control target key end

     0   :  { %s729_s15 = smov 0   ;;  %s731_s16 = smov 0   ;;  %s779_s0 = inlined_call_operand.vmem [shape: f32[2,8,512], index: 0, kind: input, shape index: {}]   ;;  %s780_s1 = inlined_call_operand.vmem [shape: f32[2,2,512], index: 1, kind: input, shape index: {}]   ;;  %s781_s2 = inlined_call_operand.vmem [shape: f32[8,16], index: 2, kind: input, shape index: {}]   ;;  %s782_s3 = inlined_call_operand.vmem [shape: f32[8,1], index: 3, kind: input, shape index: {}]   ;;  %s783_s4 = inlined_call_operand.vmem [shape: f32[2,8,512], index: 4, kind: output, shape index: {}]  }
   0x1   :  { %s733_s17 = smov 0  }
   0x2 LB: > { %s26_s18 = sadd.s32 1, %s696_s16  ;;  %p629_p0 = scmp.ge.s32.totalorder %s700_s17, 1  ;;  %s700_s17 = sphi %s733_s17, %s14_s17   ;;  %s696_s16 = sphi %s731_s16, %s785_s16   ;;  %s692_s15 = sphi %s729_s15, %s784_s15  }
   0x3   : > { %p28_p1 = scmp.ge.s32.totalorder %s26_s18, 2  ;;  %p200_p2 = scmp.lt.s32.totalorder %s700_s17, 3 }
   0x5   : > { %s787_s18 = smov (%p28_p1, %s26_s18), 0  ;;  %p201_p3 = pnand %p629_p0, %p200_p2 }
   0x6   : > { %p244_p4 = scmp.lt.s32.totalorder (!%p201_p3), %s692_s15, 1  ;;  %v279_v0 = vlaneseq (!%p201_p3)  ;;  %v360_v1 = vld [vmem:[%s782_s3] sm:$0xff] (!%p201_p3)  ;;  %v702_v2 = vmov (!%p201_p3), 0.0   ;;  %v703_v4 = vmov (!%p201_p3), 0   ;;  %vm366_vm0 = vcmask (!%p201_p3), 130048  }
   0x7   : > { %204 = sbr.rel (%p201_p3) target bundleno = 248 (0xf8), region = 36  ;;  %434 = vmatprep.mubr.f32.mxu0 (!%p201_p3), %v702_v2  ;;  %505 = vmatprep.mubr.f32.mxu1 (!%p201_p3), %v702_v2  ;;  %v359_v46 = vld [vmem:[%s781_s2] sm:$0xff] (!%p201_p3) }
   0x8   : > { %v280_v3 = vshrl.u32 (!%p201_p3), %v279_v0, 7  ;;  %677 = vset.pattern.permute.xlu0 (!%p201_p3), %v703_v4 }
   0x9   : > { %363 = vperm.xlu0 (!%p201_p3), %677, %v360_v1  }
   0xa   : > { %v281_v5 = vsub.s32 (!%p201_p3), 0, %v280_v3  ;;  %v285_v6 = vsub.s32 (!%p201_p3), 2, %v280_v3  ;;  %v321_v7 = vsub.s32 (!%p201_p3), 1, %v280_v3  ;;  %v325_v8 = vsub.s32 (!%p201_p3), 3, %v280_v3 }
   0xb   : > { %v293_v9 = vsub.s32 (!%p201_p3), 6, %v280_v3  ;;  %v333_v10 = vsub.s32 (!%p201_p3), 7, %v280_v3  ;;  %v289_v11 = vsub.s32 (!%p201_p3), 4, %v280_v3  ;;  %v329_v12 = vsub.s32 (!%p201_p3), 5, %v280_v3 }
   0xe   : > { %s789_s15 = smov (!%p244_p4, %s692_s15), 1 }
   0xf   : > { %s640_s21 = sshll.u32 %s789_s15, 5  ;;  %s641_s22 = sshll.u32 %s789_s15, 3 }
  0x10   : > { %s251_s25 = scalar_lea.vmem %s779_s0, %s640_s21  ;;  %s261_s28 = scalar_lea.vmem %s780_s1, %s641_s22 }
  0x11   : > { %v277_v13 = vld [vmem:[%s261_s28] sm:$0xff]  ;;  %v274_v18 = vld [vmem:[%s251_s25 + $0x8] sm:$0xff]  ;;  %v276_v19 = vld [vmem:[%s251_s25 + $0x18] sm:$0xff]  ;;  %s271_s7 = scalar_lea.vmem %s783_s4, %s640_s21 }
  0x12   : > { %v286_v14 = vrot.slane %v277_v13, %v285_v6  ;;  %v326_v15 = vrot.slane %v277_v13, %v325_v8  ;;  %v294_v16 = vrot.slane %v277_v13, %v293_v9  ;;  %v334_v17 = vrot.slane %v277_v13, %v333_v10  ;;  %v273_v28 = vld [vmem:[%s251_s25] sm:$0xff]  ;;  %v275_v29 = vld [vmem:[%s251_s25 + $0x10] sm:$0xff] }
  0x13   : > { %v282_v20 = vrot.slane %v277_v13, %v281_v5  ;;  %v322_v21 = vrot.slane %v277_v13, %v321_v7  ;;  %v290_v22 = vrot.slane %v277_v13, %v289_v11  ;;  %v330_v23 = vrot.slane %v277_v13, %v329_v12 }
  0x14   : > { %v306_v24 = vrot.slane %v286_v14, %v281_v5  ;;  %v346_v25 = vrot.slane %v326_v15, %v321_v7  ;;  %v314_v26 = vrot.slane %v294_v16, %v281_v5  ;;  %v354_v27 = vrot.slane %v334_v17, %v321_v7 }
  0x15   : > { %v302_v30 = vrot.slane %v282_v20, %v281_v5  ;;  %v342_v31 = vrot.slane %v322_v21, %v321_v7  ;;  %v310_v32 = vrot.slane %v290_v22, %v281_v5  ;;  %v350_v33 = vrot.slane %v330_v23, %v321_v7 }
  0x16   : > { %v316_v34 = vmul.f32 %v306_v24, %v274_v18  ;;  %v356_v35 = vmul.f32 %v346_v25, %v274_v18  ;;  %v318_v36 = vmul.f32 %v314_v26, %v276_v19  ;;  %v358_v37 = vmul.f32 %v354_v27, %v276_v19 }
  0x17   : > { %v315_v38 = vmul.f32 %v302_v30, %v273_v28  ;;  %v355_v39 = vmul.f32 %v342_v31, %v273_v28  ;;  %v317_v40 = vmul.f32 %v310_v32, %v275_v29  ;;  %v357_v41 = vmul.f32 %v350_v33, %v275_v29 }
  0x18   : > { %v643_v42 = vpack.c.bf16 %v356_v35, %v316_v34  ;;  %v647_v43 = vpack.c.bf16 %v358_v37, %v318_v36 }
  0x19   : > { %v645_v44 = vpack.c.bf16 %v355_v39, %v315_v38  ;;  %v649_v45 = vpack.c.bf16 %v357_v41, %v317_v40 }
  0x1a   : > { %644 = vmatprep.subr.bf16.mxu0 %v643_v42  ;;  %648 = vmatprep.subr.bf16.mxu1 %v647_v43 }
  0x1b   : > { %646 = vmatpush1.bf16.msra.mxu0 %v645_v44  ;;  %650 = vmatpush1.bf16.msra.mxu1 %v649_v45 }
  0x1e   : > { %636 = vmatmul.mubr.msk.f32.vlgmr.msra.gmra.mrb[0].mxu0 %vm366_vm0, %v359_v46  ;;  %637 = vmatmul.mubr.msk.f32.vlgmr.msra.gmra.mrb[0].mxu1 %vm366_vm0, %v359_v46 }
  0x88   : > { %v364_v47 = vpop.permute.xlu0 %363 }
  0xf1   : > { %v436_v48 = vpop.f32.mrb[0].mxu0  ;;  %v507_v49 = vpop.f32.mrb[0].mxu1 }
  0xf2   : > { %v437_v50 = vadd.f32 %v436_v48, %v364_v47  ;;  %v508_v51 = vadd.f32 %v507_v49, %v364_v47  ;;  %v438_v52 = vpop.f32.mrb[1].mxu0  ;;  %v509_v53 = vpop.f32.mrb[1].mxu1 }
  0xf3   : > { %v439_v54 = vadd.f32 %v438_v52, %v364_v47  ;;  %v510_v55 = vadd.f32 %v509_v53, %v364_v47 }
  0xf4   : > { %v512_v56 = vmax.f32 %v437_v50, 0.0  ;;  %v514_v57 = vmax.f32 %v508_v51, 0.0 }
  0xf5   : > { %v513_v58 = vmax.f32 %v439_v54, 0.0  ;;  %v515_v59 = vmax.f32 %v510_v55, 0.0 }
  0xf6   : > { %516 = vst [vmem:[%s271_s7] sm:$0xff] %v512_v56  ;;  %518 = vst [vmem:[%s271_s7 + $0x10] sm:$0xff] %v514_v57 }
  0xf7   : > { %517 = vst [vmem:[%s271_s7 + $0x8] sm:$0xff] %v513_v58  ;;  %519 = vst [vmem:[%s271_s7 + $0x18] sm:$0xff] %v515_v59 }
  0xf8 PF: > { %s14_s17 = sadd.s32 1, %s700_s17   ;;  %s784_s15 = smov %s696_s16 }
  0xf9   : > { %p11_p5 = scmp.ge.s32.totalorder %s14_s17, 4   ;;  %s785_s16 = smov %s787_s18 }
  0xfb   :  { %13 = sbr.rel (!%p11_p5) target bundleno = 2 (0x2), region = 69 }

</bundles_post_ra>
